<compile_context>
chip_gen: v7x
topology: tpu7x:2x2x1
jax: 0.10.0
libtpu: 0.0.40
codegen_flags: <defaults>
</compile_context>

<pallas_src>
import math

import jax
import jax.numpy as jnp
from jax.experimental import pallas as pl
from jax.experimental.pallas import tpu as pltpu


def _channel_weights_kernel(x_ref, w_ref, o_ref):
    # x_ref: (tr, W), w_ref: (1, W) -> VPU broadcast multiply (torch-style promotion).
    o_ref[...] = (x_ref[...] * w_ref[...]).astype(o_ref.dtype)


def _vmem_capacity_bytes(default=64 << 20):
    """Physical VMEM per TensorCore; conservative (v7x-sized) fallback."""
    try:
        cap = getattr(pltpu.get_tpu_info(), "vmem_capacity_bytes", None)
        if cap:
            return int(cap)
    except Exception:
        pass
    return default


def channel_weights(x, weights, *, target_lanes=1024, block_bytes=None):
    """Apply per-last-dim weights: out[..., c] = x[..., c] * weights[c]."""
    orig_shape = x.shape
    c = orig_shape[-1]
    assert weights.shape == (c,), "weights must match last dim of x"

    out_dtype = jnp.result_type(x.dtype, weights.dtype)
    in_itemsize = jnp.dtype(x.dtype).itemsize
    out_itemsize = jnp.dtype(out_dtype).itemsize
    n = x.size

    # ---- Lane-dense packed width W = R * C, a multiple of 128 and >= target.
    w_lane = (c * 128) // math.gcd(c, 128)  # lcm(C, 128)
    if w_lane > 4096:
        # Degenerate large/odd C: fall back to the natural width (block last
        # dim still equals the full array dim -> correct, just less lane-dense).
        w_lane = c
    while w_lane < target_lanes:
        w_lane *= 2
    r = w_lane // c  # rows of C packed per lane-dense row

    # ---- Packed 2-D view: only the final grid block may be ragged.
    rows = -(-n // w_lane)      # ceil(n / w_lane)
    n_pad = rows * w_lane       # pad by at most W-1 elements

    # ---- Generation-aware block budget + sublane-packed row tile.
    vmem_cap = _vmem_capacity_bytes()
    if block_bytes is None:
        # ~8 MiB per buffer on v7x (64 MiB VMEM) and v5e/v6e (128 MiB), floor 2 MiB.
        block_bytes = int(min(8 << 20, max(2 << 20, vmem_cap // 8)))
    pack = max(1, 32 // in_itemsize)  # sublane packing: 8 f32 / 16 bf16 / 32 i8
    bytes_per_row = w_lane * (in_itemsize + out_itemsize)
    tr = ((2 * block_bytes) // bytes_per_row) // pack * pack
    tr = max(pack, tr)

    # Keep >= ~4 grid steps so DMA/compute/writeback overlap and megacore
    # sharding (v7x) stay active even for small inputs.
    min_steps = 4
    tr_cap = -(-rows // min_steps)       # ceil(rows / min_steps)
    tr_cap = -(-tr_cap // pack) * pack   # round up to sublane packing
    tr = max(pack, min(tr, tr_cap))

    grid = (pl.cdiv(rows, tr),)

    # ---- Flat view, padded only up to a multiple of W (copy-free if n % W == 0).
    x_flat = x.reshape(-1)
    if n_pad > n:
        x_flat = jnp.pad(x_flat, (0, n_pad - n))
    x2d = x_flat.reshape(rows, w_lane)

    # Tiled weight row (1, W): identical block every grid step -> stays resident.
    # Weights keep their own dtype so the multiply promotes like PyTorch.
    w_row = jnp.tile(weights, r).reshape(1, w_lane)

    # ---- Explicit scoped-VMEM limit: 2-deep double buffering of the in+out
    # blocks plus the resident weight row (v5e's default scoped VMEM is 16 MiB).
    w_row_bytes = w_lane * jnp.dtype(weights.dtype).itemsize
    needed = 2 * tr * w_lane * (in_itemsize + out_itemsize) + w_row_bytes + (4 << 20)
    vmem_limit = int(min(max(needed, 32 << 20), max(32 << 20, vmem_cap - (8 << 20))))

    out2d = pl.pallas_call(
        _channel_weights_kernel,
        out_shape=jax.ShapeDtypeStruct((rows, w_lane), out_dtype),
        grid_spec=pltpu.PrefetchScalarGridSpec(
            num_scalar_prefetch=0,
            grid=grid,
            in_specs=[
                # Lane-dense row tile i of x (last block may be ragged/masked).
                pl.BlockSpec((tr, w_lane), lambda i: (i, 0)),
                # Weights: identical (1, W) block every step (kept resident).
                pl.BlockSpec((1, w_lane), lambda i: (0, 0)),
            ],
            out_specs=pl.BlockSpec((tr, w_lane), lambda i: (i, 0)),
        ),
        compiler_params=pltpu.CompilerParams(
            dimension_semantics=("parallel",),
            vmem_limit_bytes=vmem_limit,
        ),
    )(x2d, w_row)

    if n_pad == n:
        return out2d.reshape(orig_shape)
    return out2d.reshape(-1)[:n].reshape(orig_shape)


if __name__ == "__main__":
    key = jax.random.PRNGKey(0)

    # Small shapes: batch=2, spatial=16x16, channels=4 (channels-last layout).
    batch, h, w, num_channels = 2, 16, 16, 4
    x = jax.random.normal(key, (batch, h, w, num_channels), dtype=jnp.float32)

    # Parameter init matching nn.Parameter(torch.ones(C)).
    weights = jnp.ones((num_channels,), dtype=jnp.float32)

    out = jax.block_until_ready(channel_weights(x, weights))
    assert out.shape == x.shape
    assert jnp.allclose(out, x * weights, atol=1e-6), "mismatch (ones weights)"

    # Non-trivial weights + a shape exercising the ragged / padded path.
    w2 = jnp.arange(1.0, num_channels + 1.0, dtype=jnp.float32)
    out2 = jax.block_until_ready(channel_weights(x, w2))
    assert jnp.allclose(out2, x * w2, atol=1e-6), "mismatch (varied weights)"

    key2 = jax.random.PRNGKey(1)
    x3 = jax.random.normal(key2, (2, 7, 9, num_channels), dtype=jnp.float32)
    out3 = jax.block_until_ready(channel_weights(x3, w2))
    assert jnp.allclose(out3, x3 * w2, atol=1e-6), "mismatch (padded case)"

    print("KERNEL_OK")
</pallas_src>

<mosaic_0001>
module attributes {stable_mosaic.version = 11 : i64} {
  func.func @_channel_weights_kernel(%arg0: i32, %arg1: memref<8x1024xf32, #tpu.memory_space<vmem>>, %arg2: memref<1x1024xf32, #tpu.memory_space<vmem>>, %arg3: memref<8x1024xf32, #tpu.memory_space<vmem>>) attributes {dimension_semantics = [#tpu.dimension_semantics<parallel>], iteration_bounds = array<i64: 1>, scalar_prefetch = 0 : i64, scratch_operands = 0 : i64, tpu.core_type = #tpu.core_type<tc>, window_params = [{transform_indices = @transform_0, window_bounds = array<i64: 8, 1024>}, {pipeline_mode = #tpu.pipeline_mode<synchronous>, transform_indices = @transform_1, window_bounds = array<i64: 1, 1024>}, {transform_indices = @transform_2, window_bounds = array<i64: 8, 1024>}]} {
    %c0 = arith.constant 0 : index
    %c0_0 = arith.constant 0 : index
    %0 = vector.load %arg1[%c0, %c0_0] : memref<8x1024xf32, #tpu.memory_space<vmem>>, vector<8x1024xf32>
    %c0_1 = arith.constant 0 : index
    %c0_2 = arith.constant 0 : index
    %1 = vector.load %arg2[%c0_1, %c0_2] : memref<1x1024xf32, #tpu.memory_space<vmem>>, vector<1x1024xf32>
    %2 = vector.broadcast %1 : vector<1x1024xf32> to vector<8x1024xf32>
    %3 = arith.mulf %0, %2 : vector<8x1024xf32>
    %c0_3 = arith.constant 0 : index
    %c0_4 = arith.constant 0 : index
    %4 = vector.load %arg3[%c0_3, %c0_4] : memref<8x1024xf32, #tpu.memory_space<vmem>>, vector<8x1024xf32>
    tpu.vector_store %arg3[%c0_3, %c0_4], %3 {strides = array<i32>} : memref<8x1024xf32, #tpu.memory_space<vmem>>, vector<8x1024xf32>,
    return
  }
  func.func @transform_0(%arg0: i32) -> (i32, i32) {
    %c0_i32 = arith.constant 0 : i32
    %c0_i32_0 = arith.constant 0 : i32
    return %arg0, %c0_i32 : i32, i32
  }
  func.func @transform_1(%arg0: i32) -> (i32, i32) {
    %c0_i32 = arith.constant 0 : i32
    %c0_i32_0 = arith.constant 0 : i32
    %c0_i32_1 = arith.constant 0 : i32
    return %c0_i32, %c0_i32_0 : i32, i32
  }
  func.func @transform_2(%arg0: i32) -> (i32, i32) {
    %c0_i32 = arith.constant 0 : i32
    %c0_i32_0 = arith.constant 0 : i32
    return %arg0, %c0_i32 : i32, i32
  }
}

</mosaic_0001>

<bundles_post_ra>
// kernel: tpu_custom_call.1
= control target key start
LH: loop header
LB: loop body
LE: loop exit
PB: predicated region body
PF: predicated region fallthrough
CT: control target
= control target key end

     0   :  { %7 = vsyncpa [#allocation3], 0  ;;  %s335_s0 = inlined_call_operand.hbm [shape: f32[2,1024], index: 0, kind: input, shape index: {}]   ;;  %s336_s1 = inlined_call_operand.hbm [shape: f32[1,1024], index: 1, kind: input, shape index: {}]   ;;  %s337_s2 = inlined_call_operand.hbm [shape: f32[2,1024], index: 2, kind: output, shape index: {}]  }
   0x1   :  { %8 = vsyncpa [#allocation6], 0 }
   0x2   :  { %9 = vsyncpa [#allocation4], 0 }
   0x3   :  { %14 = vsyncadd [#allocation3], 768  ;;  %s272_s9 = smov [#allocation2]   ;;  %s200_s13 = scalar_lea.hbm %s335_s0, 256 }
   0x4   :  { %s15_s10 = sshll.u32 %s272_s9, 4  ;;  %p201_p0 = scmp.ne.s32.totalorder %s335_s0, %s200_s13  ;;  %s16_s10 = int_to_ptr.vmem [resolvable:$true] %s15_s10 }
   0x5   :  { %p204_p1 = scmp.lt.u32.totalorder %s200_s13, %s335_s0 }
   0x7   :  { %p206_p2 = pnand %p204_p1, %p201_p0 }
   0x9   :  { %209 = shalt.err (!%p206_p2)
}
   0xa   :  { %s210_s18 = scalar_lea.vmem %s16_s10, 256  ;;  %s214_s19 = scalar_lea.vmem %s16_s10, 1024 }
   0xb   :  { %p211_p3 = scmp.ne.s32.totalorder %s16_s10, %s210_s18  ;;  %p215_p4 = scmp.lt.s32.totalorder %s16_s10, %s16_s10 }
   0xc   :  { %p216_p5 = scmp.lt.s32.totalorder %s214_s19, %s210_s18 }
   0xe   :  { %p217_p6 = por %p216_p5, %p215_p4 }
  0x10   :  { %p218_p7 = pnand %p217_p6, %p211_p3 }
  0x12   :  { %221 = shalt.err (!%p218_p7)
}
  0x13   :  { %s273_s20 = smov 256   ;;  %s274_s21 = smov 16  }
  0x14   :  { %21 = dma.hbm_to_vmem [thread:$0]  %s335_s0, 256, %s16_s10, [#allocation3], %s273_s20, %s273_s20, %s274_s21  }
  0x15   :  { %s275_s24 = smov [#allocation5]   ;;  %s222_s28 = scalar_lea.hbm %s336_s1, 128 }
  0x16   :  { %s28_s25 = sshll.u32 %s275_s24, 4  ;;  %p223_p8 = scmp.ne.s32.totalorder %s336_s1, %s222_s28  ;;  %s29_s25 = int_to_ptr.vmem [resolvable:$true] %s28_s25 }
  0x17   :  { %p226_p9 = scmp.lt.u32.totalorder %s222_s28, %s336_s1 }
  0x19   :  { %p228_p10 = pnand %p226_p9, %p223_p8 }
  0x1b   :  { %231 = shalt.err (!%p228_p10)
}
  0x1c   :  { %s232_s5 = scalar_lea.vmem %s29_s25, 128  ;;  %p237_p12 = scmp.lt.s32.totalorder %s29_s25, %s29_s25 }
  0x1d   :  { %p233_p11 = scmp.ne.s32.totalorder %s29_s25, %s232_s5  ;;  %p238_p13 = scmp.lt.s32.totalorder %s232_s5, %s232_s5 }
  0x1f   :  { %p239_p0 = por %p238_p13, %p237_p12 }
  0x21   :  { %p240_p1 = pnand %p239_p0, %p233_p11 }
  0x23   :  { %243 = shalt.err (!%p240_p1)
}
  0x24   :  { %31 = dma.hbm_to_vmem [thread:$0]  %s336_s1, 128, %s29_s25, [#allocation6]  }
  0x25   :  { %266 = dma.done.wait [#allocation3], 1024  }
  0x26   :  { %267 = vsyncadd [#allocation3], 4294966272 }
  0x27   :  { %268 = dma.done.wait [#allocation6], 128  }
  0x28   :  { %269 = vsyncadd [#allocation6], 4294967168  ;;  %v48_v0 = vlaneseq  ;;  %v276_v1 = vmov 1983009808   ;;  %v46_v13 = vld [vmem:[#allocation5] sm:$0xff]  ;;  %v39_v34 = vld [vmem:[#allocation2 + $0x8] sm:$0xff] }
  0x29   :  { %v85_v2 = vunpack.c.l.s4 %v276_v1  ;;  %v38_v31 = vld [vmem:[#allocation2] sm:$0xff]  ;;  %v40_v39 = vld [vmem:[#allocation2 + $0x10] sm:$0xff]  ;;  %v41_v46 = vld [vmem:[#allocation2 + $0x18] sm:$0xff] }
  0x2a   :  { %v49_v3 = vshrl.u32 %v48_v0, 7  ;;  %v42_v40 = vld [vmem:[#allocation2 + $0x20] sm:$0xff]  ;;  %v44_v43 = vld [vmem:[#allocation2 + $0x30] sm:$0xff]  ;;  %v43_v48 = vld [vmem:[#allocation2 + $0x28] sm:$0xff] }
  0x2b   :  { %v86_v4 = vunpack.c.0.s8 %v85_v2  ;;  %v45_v50 = vld [vmem:[#allocation2 + $0x38] sm:$0xff] }
  0x2c   :  { %v50_v5 = vsub.s32 0, %v49_v3  ;;  %v54_v6 = vsub.s32 1, %v49_v3  ;;  %v58_v7 = vsub.s32 2, %v49_v3  ;;  %v62_v8 = vsub.s32 3, %v49_v3 }
  0x2d   :  { %v66_v9 = vsub.s32 4, %v49_v3  ;;  %v70_v10 = vsub.s32 5, %v49_v3  ;;  %v74_v11 = vsub.s32 6, %v49_v3  ;;  %v78_v12 = vsub.s32 7, %v49_v3 }
  0x2e   :  { %v89_v14 = vsub.s32 %v86_v4, %v49_v3  ;;  %v51_v15 = vrot.slane %v46_v13, %v50_v5  ;;  %v55_v16 = vrot.slane %v46_v13, %v54_v6  ;;  %v59_v17 = vrot.slane %v46_v13, %v58_v7 }
  0x2f   :  { %v63_v18 = vrot.slane %v46_v13, %v62_v8  ;;  %v67_v19 = vrot.slane %v46_v13, %v66_v9  ;;  %v71_v20 = vrot.slane %v46_v13, %v70_v10  ;;  %v75_v21 = vrot.slane %v46_v13, %v74_v11 }
  0x30   :  { %v79_v22 = vrot.slane %v46_v13, %v78_v12  ;;  %v80_v23 = vcombine.low %v51_v15, %v55_v16  ;;  %v81_v25 = vcombine.high %v51_v15, %v55_v16 }
  0x31   :  { %v82_v24 = vcombine.low %v59_v17, %v63_v18  ;;  %v83_v26 = vcombine.high %v59_v17, %v63_v18  ;;  %v116_v27 = vcombine.low %v67_v19, %v71_v20  ;;  %v117_v29 = vcombine.high %v67_v19, %v71_v20 }
  0x32   :  { %v118_v28 = vcombine.low %v75_v21, %v79_v22  ;;  %v119_v30 = vcombine.high %v75_v21, %v79_v22  ;;  %v90_v32 = vrot.slane %v80_v23, %v89_v14  ;;  %v97_v35 = vrot.slane %v81_v25, %v89_v14 }
  0x33   :  { %v104_v33 = vrot.slane %v82_v24, %v89_v14  ;;  %v111_v36 = vrot.slane %v83_v26, %v89_v14  ;;  %v126_v37 = vrot.slane %v116_v27, %v89_v14  ;;  %v133_v41 = vrot.slane %v117_v29, %v89_v14 }
  0x34   :  { %v140_v38 = vrot.slane %v118_v28, %v89_v14  ;;  %v147_v42 = vrot.slane %v119_v30, %v89_v14 }
  0x35   :  { %v112_v44 = vcombine.low %v90_v32, %v104_v33  ;;  %v113_v45 = vcombine.high %v90_v32, %v104_v33  ;;  %v114_v47 = vcombine.low %v97_v35, %v111_v36  ;;  %v115_v49 = vcombine.high %v97_v35, %v111_v36 }
  0x36   :  { %v148_v51 = vcombine.low %v126_v37, %v140_v38  ;;  %v149_v52 = vcombine.high %v126_v37, %v140_v38  ;;  %v150_v53 = vcombine.low %v133_v41, %v147_v42  ;;  %v151_v54 = vcombine.high %v133_v41, %v147_v42 }
  0x37   :  { %v160_v55 = vmul.f32 %v112_v44, %v38_v31  ;;  %v162_v56 = vmul.f32 %v113_v45, %v40_v39  ;;  %v164_v57 = vmul.f32 %v114_v47, %v42_v40  ;;  %v166_v58 = vmul.f32 %v115_v49, %v44_v43 }
  0x38   :  { %v161_v59 = vmul.f32 %v148_v51, %v39_v34  ;;  %v163_v60 = vmul.f32 %v149_v52, %v41_v46  ;;  %v165_v61 = vmul.f32 %v150_v53, %v43_v48  ;;  %v167_v62 = vmul.f32 %v151_v54, %v45_v50 }
  0x39   :  { %168 = vst [vmem:[#allocation7] sm:$0xff] %v160_v55  ;;  %170 = vst [vmem:[#allocation7 + $0x10] sm:$0xff] %v162_v56 }
  0x3a   :  { %172 = vst [vmem:[#allocation7 + $0x20] sm:$0xff] %v164_v57  ;;  %174 = vst [vmem:[#allocation7 + $0x30] sm:$0xff] %v166_v58 }
  0x3b   :  { %169 = vst [vmem:[#allocation7 + $0x8] sm:$0xff] %v161_v59  ;;  %171 = vst [vmem:[#allocation7 + $0x18] sm:$0xff] %v163_v60 }
  0x3c   :  { %173 = vst [vmem:[#allocation7 + $0x28] sm:$0xff] %v165_v61  ;;  %175 = vst [vmem:[#allocation7 + $0x38] sm:$0xff] %v167_v62 }
  0x3d   :  { %180 = vsyncadd [#allocation4], 768  ;;  %s277_s1 = smov [#allocation7]  }
  0x3e   :  { %s181_s7 = sshll.u32 %s277_s1, 4  ;;  %s182_s7 = int_to_ptr.vmem [resolvable:$true] %s181_s7 }
  0x3f   :  { %s244_s8 = scalar_lea.vmem %s182_s7, 256  ;;  %s248_s9 = scalar_lea.vmem %s182_s7, 1024 }
  0x40   :  { %p245_p2 = scmp.ne.s32.totalorder %s182_s7, %s244_s8  ;;  %p249_p3 = scmp.lt.s32.totalorder %s182_s7, %s182_s7 }
  0x41   :  { %p250_p4 = scmp.lt.s32.totalorder %s248_s9, %s244_s8 }
  0x43   :  { %p251_p5 = por %p250_p4, %p249_p3 }
  0x45   :  { %p252_p6 = pnand %p251_p5, %p245_p2 }
  0x47   :  { %255 = shalt.err (!%p252_p6)
}
  0x48   :  { %s256_s12 = scalar_lea.hbm %s337_s2, 256 }
  0x49   :  { %p257_p7 = scmp.ne.s32.totalorder %s337_s2, %s256_s12  ;;  %p260_p8 = scmp.lt.u32.totalorder %s256_s12, %s337_s2 }
  0x4b   :  { %p262_p9 = pnand %p260_p8, %p257_p7 }
  0x4d   :  { %265 = shalt.err (!%p262_p9)
}
  0x4e   :  { %187 = dma.vmem_to_hbm [thread:$0]  %s182_s7, 256, %s337_s2, [#allocation4], %s273_s20, %s273_s20, %s274_s21  }
  0x4f   :  { %270 = dma.done.wait [#allocation4], 1024  }
  0x50   :  { %271 = vsyncadd [#allocation4], 4294966272 }
  0x51   :  { %191 = vsyncpa [#allocation3], 1 }
  0x52   :  { %192 = vsyncpa [#allocation6], 1 }
  0x53   :  { %193 = vsyncpa [#allocation4], 1 }

</bundles_post_ra>
